<compile_context>
chip_gen: v5e
topology: v5e:2x2
jax: 0.10.0
libtpu: 0.0.40
codegen_flags: <defaults>
</compile_context>

<pallas_src>
import jax
import jax.numpy as jnp
from jax.experimental import pallas as pl
from jax.experimental.pallas import tpu as pltpu


def _outconv_kernel(x_ref, w_ref, b_ref, o_ref):
    # x_ref: (C_in, tp)    tile of pixels (pixels on lanes)
    # w_ref: (C_out, C_in) full conv weight (no transpose)
    # b_ref: (C_out, 1)    bias
    # o_ref: (C_out, tp)
    acc = jnp.dot(w_ref[...], x_ref[...], preferred_element_type=jnp.float32)
    o_ref[...] = (acc + b_ref[...]).astype(o_ref.dtype)


def _vmem_capacity_bytes():
    """Per-TensorCore VMEM capacity; falls back to 128 MiB if the query fails."""
    try:
        return int(pltpu.get_tpu_info().vmem_capacity_bytes)
    except Exception:
        return 128 * 1024 * 1024


def outconv_pallas(x_nchw, weight, bias, *, pixel_tile=None):
    """1x1 conv. x_nchw: (N, C_in, H, W); weight: (C_out, C_in, 1, 1); bias: (C_out,)."""
    N, C_in, H, W = x_nchw.shape
    C_out = weight.shape[0]
    P = H * W

    # Free reshapes only — no HBM transposes, pads, or slices in the wrapper.
    x3d = x_nchw.reshape(N, C_in, P)          # (N, C_in, H*W), pixels contiguous
    w2d = weight.reshape(C_out, C_in)         # used as-is inside the kernel
    b2d = bias.reshape(C_out, 1)

    x_itemsize = jnp.dtype(x_nchw.dtype).itemsize
    w_itemsize = jnp.dtype(weight.dtype).itemsize

    vmem_cap = _vmem_capacity_bytes()
    small_vmem = vmem_cap < 100 * 1024 * 1024   # v7x-like: 64 MiB/TC, 2 TCs/chip

    # ---- Pixel tile selection (lane axis) --------------------------------
    # Target streamed input bytes per grid step: enough to amortize the
    # ~0.35 us fixed per-step cost against each generation's HBM bandwidth.
    target_in_bytes = (3 if small_vmem else 1) * 1024 * 1024
    if pixel_tile is None:
        tp = target_in_bytes // max(1, C_in * x_itemsize)
    else:
        tp = int(pixel_tile)

    # Keep the double-buffered x + out working set well inside VMEM.
    per_pixel_bytes = 2 * (C_in + C_out) * x_itemsize   # 2 buffers per streamed array
    tp = min(tp, (6 * vmem_cap // 10) // max(1, per_pixel_bytes))

    # Lane-dense multiple of 128, clamped to the (rounded-up) pixel count so
    # tiny inputs don't get over-tiled.
    tp = max(128, (tp // 128) * 128)
    tp = min(tp, pl.cdiv(P, 128) * 128)

    # Dual-TC chips: make sure the 'parallel' grid has >=2 steps when N == 1.
    if small_vmem and N == 1:
        tp = min(tp, max(128, pl.cdiv(pl.cdiv(P, 2), 128) * 128))

    grid = (N, pl.cdiv(P, tp))   # ragged tail handled by Pallas (masked store)

    # ---- Compiler params / cost ------------------------------------------
    tile_bytes = per_pixel_bytes * tp + (C_out * (C_in + 1)) * w_itemsize
    vmem_cap_limit = (48 if small_vmem else 100) * 1024 * 1024
    vmem_limit = int(min(vmem_cap_limit, max(16 * 1024 * 1024, 4 * tile_bytes)))

    cost = pl.CostEstimate(
        flops=2 * N * P * C_in * C_out,
        transcendentals=0,
        bytes_accessed=(N * P * (C_in + C_out)) * x_itemsize
        + (C_out * (C_in + 1)) * w_itemsize,
    )

    out3d = pl.pallas_call(
        _outconv_kernel,
        out_shape=jax.ShapeDtypeStruct((N, C_out, P), x_nchw.dtype),
        grid=grid,
        in_specs=[
            # Batch dim squeezed out; pixels tiled on the lane axis.
            # If a trace ever shows exposed DMA, add pipeline_mode=pl.Buffered(3) here.
            pl.BlockSpec((None, C_in, tp), lambda n, j: (n, 0, j)),
            pl.BlockSpec((C_out, C_in), lambda n, j: (0, 0)),   # resident weight
            pl.BlockSpec((C_out, 1), lambda n, j: (0, 0)),      # resident bias
        ],
        out_specs=pl.BlockSpec((None, C_out, tp), lambda n, j: (n, 0, j)),
        compiler_params=pltpu.CompilerParams(
            # Both grid axes are independent output tiles -> shardable across
            # TensorCores on v7x; harmless no-op on v5e/v6e.
            dimension_semantics=("parallel", "parallel"),
            vmem_limit_bytes=vmem_limit,
        ),
        cost_estimate=cost,
    )(x3d, w2d, b2d)

    return out3d.reshape(N, C_out, H, W)


if __name__ == "__main__":
    # Small shapes consistent with OutConv: batch=2, in_channels=4,
    # out_channels=3, spatial=16x16.
    N, C_in, C_out, H, W = 2, 4, 3, 16, 16

    key = jax.random.PRNGKey(0)
    kx, kw, kb = jax.random.split(key, 3)

    x = jax.random.normal(kx, (N, C_in, H, W), dtype=jnp.float32)
    # Deterministic synthetic parameters (same shapes as nn.Conv2d(C_in, C_out, 1)).
    weight = jax.random.normal(kw, (C_out, C_in, 1, 1), dtype=jnp.float32) * 0.1
    bias = jax.random.normal(kb, (C_out,), dtype=jnp.float32) * 0.1

    y = outconv_pallas(x, weight, bias)
    y = jax.block_until_ready(y)

    # Reference check in plain JAX (same math as nn.Conv2d kernel_size=1).
    ref = jnp.einsum("nchw,oc->nohw", x, weight.reshape(C_out, C_in)) \
        + bias[None, :, None, None]
    assert y.shape == (N, C_out, H, W)
    assert jnp.allclose(y, ref, atol=1e-5, rtol=1e-5)

    # Also exercise a non-128-divisible pixel count to cover the ragged tail path.
    H2, W2 = 13, 11
    x2 = jax.random.normal(kx, (1, C_in, H2, W2), dtype=jnp.float32)
    y2 = jax.block_until_ready(outconv_pallas(x2, weight, bias))
    ref2 = jnp.einsum("nchw,oc->nohw", x2, weight.reshape(C_out, C_in)) \
        + bias[None, :, None, None]
    assert jnp.allclose(y2, ref2, atol=1e-5, rtol=1e-5)

    print("KERNEL_OK")
</pallas_src>

<mosaic_0001>
module attributes {stable_mosaic.version = 11 : i64} {
  func.func @_outconv_kernel(%arg0: i32, %arg1: i32, %arg2: memref<1x4x256xf32, #tpu.memory_space<vmem>>, %arg3: memref<3x4xf32, #tpu.memory_space<vmem>>, %arg4: memref<3x1xf32, #tpu.memory_space<vmem>>, %arg5: memref<1x3x256xf32, #tpu.memory_space<vmem>>) attributes {dimension_semantics = [#tpu.dimension_semantics<parallel>, #tpu.dimension_semantics<parallel>], iteration_bounds = array<i64: 2, 1>, scalar_prefetch = 0 : i64, scratch_operands = 0 : i64, tpu.core_type = #tpu.core_type<tc>, window_params = [{transform_indices = @transform_0, window_bounds = array<i64: 1, 4, 256>}, {pipeline_mode = #tpu.pipeline_mode<synchronous>, transform_indices = @transform_1, window_bounds = array<i64: 3, 4>}, {pipeline_mode = #tpu.pipeline_mode<synchronous>, transform_indices = @transform_2, window_bounds = array<i64: 3, 1>}, {transform_indices = @transform_3, window_bounds = array<i64: 1, 3, 256>}]} {
    %c0 = arith.constant 0 : index
    %c0_0 = arith.constant 0 : index
    %0 = vector.load %arg3[%c0, %c0_0] : memref<3x4xf32, #tpu.memory_space<vmem>>, vector<3x4xf32>
    %c0_1 = arith.constant 0 : index
    %c0_2 = arith.constant 0 : index
    %c0_3 = arith.constant 0 : index
    %1 = vector.load %arg2[%c0_1, %c0_2, %c0_3] : memref<1x4x256xf32, #tpu.memory_space<vmem>>, vector<1x4x256xf32>
    %2 = vector.shape_cast %1 : vector<1x4x256xf32> to vector<4x256xf32>
    %cst = arith.constant dense<0.000000e+00> : vector<3x256xf32>
    %3 = tpu.matmul %0, %2, %cst {dimension_numbers = #tpu.dot_dimension_numbers<[1], [0], [0], [1], [0, 0, 1, 1], [], []>} : vector<3x4xf32>, vector<4x256xf32>, vector<3x256xf32> -> vector<3x256xf32>
    %c0_4 = arith.constant 0 : index
    %c0_5 = arith.constant 0 : index
    %4 = vector.load %arg4[%c0_4, %c0_5] : memref<3x1xf32, #tpu.memory_space<vmem>>, vector<3x1xf32>
    %5 = vector.broadcast %4 : vector<3x1xf32> to vector<3x256xf32>
    %6 = arith.addf %3, %5 : vector<3x256xf32>
    %c0_6 = arith.constant 0 : index
    %c0_7 = arith.constant 0 : index
    %c0_8 = arith.constant 0 : index
    %7 = vector.load %arg5[%c0_6, %c0_7, %c0_8] : memref<1x3x256xf32, #tpu.memory_space<vmem>>, vector<1x3x256xf32>
    %8 = vector.shape_cast %7 : vector<1x3x256xf32> to vector<3x256xf32>
    %9 = vector.shape_cast %6 : vector<3x256xf32> to vector<1x3x256xf32>
    tpu.vector_store %arg5[%c0_6, %c0_7, %c0_8], %9 {strides = array<i32>} : memref<1x3x256xf32, #tpu.memory_space<vmem>>, vector<1x3x256xf32>,
    return
  }
  func.func @transform_0(%arg0: i32, %arg1: i32) -> (i32, i32, i32) {
    %c0_i32 = arith.constant 0 : i32
    %c0_i32_0 = arith.constant 0 : i32
    return %arg0, %c0_i32, %arg1 : i32, i32, i32
  }
  func.func @transform_1(%arg0: i32, %arg1: i32) -> (i32, i32) {
    %c0_i32 = arith.constant 0 : i32
    %c0_i32_0 = arith.constant 0 : i32
    %c0_i32_1 = arith.constant 0 : i32
    return %c0_i32, %c0_i32_0 : i32, i32
  }
  func.func @transform_2(%arg0: i32, %arg1: i32) -> (i32, i32) {
    %c0_i32 = arith.constant 0 : i32
    %c0_i32_0 = arith.constant 0 : i32
    %c0_i32_1 = arith.constant 0 : i32
    return %c0_i32, %c0_i32_0 : i32, i32
  }
  func.func @transform_3(%arg0: i32, %arg1: i32) -> (i32, i32, i32) {
    %c0_i32 = arith.constant 0 : i32
    %c0_i32_0 = arith.constant 0 : i32
    return %arg0, %c0_i32, %arg1 : i32, i32, i32
  }
}

</mosaic_0001>

<bundles_post_ra>
// kernel: tpu_custom_call.1
= control target key start
LH: loop header
LB: loop body
LE: loop exit
PB: predicated region body
PF: predicated region fallthrough
CT: control target
= control target key end

     0   :  { %8 = vsyncpa [#allocation3], 0  ;;  %s657_s0 = inlined_call_operand.hbm [shape: f32[2,4,256], index: 0, kind: input, shape index: {}]   ;;  %s658_s1 = inlined_call_operand.vmem [shape: f32[3,4], index: 1, kind: input, shape index: {}]   ;;  %s659_s2 = inlined_call_operand.vmem [shape: f32[3,1], index: 2, kind: input, shape index: {}]   ;;  %s660_s3 = inlined_call_operand.vmem [shape: f32[2,3,256], index: 3, kind: output, shape index: {}]  }
   0x1   :  { %10 = vsyncpa [#allocation3 + $0x1], 0  ;;  %s560_s12 = smov 0   ;;  %s562_s13 = smov 0  }
   0x2   :  { %s564_s14 = smov 0   ;;  %s566_s15 = smov 0  }
   0x3   :  { %s568_s16 = smov 0   ;;  %s570_s17 = smov 0  }
   0x4 LB: > { %s381_s18 = sadd.s32 4294967295, %s537_s17   ;;  %s28_s19 = sadd.s32 1, %s533_s16  ;;  %s537_s17 = sphi %s570_s17, %s16_s17   ;;  %s533_s16 = sphi %s568_s16, %s667_s16   ;;  %s529_s15 = sphi %s566_s15, %s666_s15   ;;  %s525_s14 = sphi %s564_s14, %s665_s14   ;;  %s521_s13 = sphi %s562_s13, %s664_s13   ;;  %s517_s12 = sphi %s560_s12, %s663_s12  }
   0x5   : > { %p30_p0 = scmp.ge.s32.totalorder %s28_s19, 2  ;;  %s37_s20 = sadd.s32 1, %s525_s14 }
   0x6   : > { %p44_p1 = scmp.ne.s32.totalorder %s525_s14, %s521_s13  ;;  %p45_p2 = scmp.eq.s32.totalorder %s537_s17, 0 }
   0x7   : > { %s669_s19 = smov (%p30_p0, %s28_s19), 0  ;;  %p50_p4 = scmp.ne.s32.totalorder %s521_s13, %s517_s12 }
   0x8   : > { %p596_p3 = por %p45_p2, %p44_p1  ;;  %s32_s22 = ssub.s32 %s533_s16, %s669_s19 }
   0x9   : > { %p51_p5 = scmp.eq.s32.totalorder %s381_s18, 0  ;;  %p35_p6 = scmp.eq.s32.totalorder %s32_s22, 0 }
   0xa   : > { %p406_p8 = scmp.lt.s32.totalorder %s537_s17, 2  ;;  %s150_s25 = sand.u32 1, %s525_s14  }
   0xb   : > { %p603_p7 = por %p51_p5, %p50_p4  ;;  %s398_s26 = sshll.u32 %s533_s16, 3 }
   0xc   : > { %s609_s24 = scalar_select %p35_p6, %s525_s14, %s37_s20  }
   0xd   : > { %s385_s27 = sshll.u32 %s150_s25, 3  ;;  %s161_s30 = scalar_lea.hbm %s657_s0, %s398_s26 }
   0xe   : > { %s163_s4 = sshll.u32 %s161_s30, 4  ;;  %s154_s5 = scalar_lea.vmem [#allocation2], %s385_s27  ;;  %s164_s4 = int_to_ptr.hbm [resolvable:$true] %s163_s4 }
   0xf   : > { %s165_s6 = sshll.u32 %s154_s5, 4  ;;  %p403_p9 = pnand %p406_p8, %p596_p3  ;;  %s166_s6 = int_to_ptr.vmem [resolvable:$true] %s165_s6 }
  0x10   : > { %p388_p10 = scmp.ge.s32.totalorder %s537_s17, 1  ;;  %p170_p11 = scmp.lt.s32.totalorder %s537_s17, 3 }
  0x11   : > { %s151_s7 = scalar_lea.sflag [#allocation3], %s150_s25 }
  0x12   : > { %405 = dma.hbm_to_vmem [thread:$0]  (!%p403_p9), %s164_s4, 128, %s166_s6, %s151_s7  }
  0x13   : > { %p171_p12 = pnand %p388_p10, %p170_p11 }
  0x14   : > { %s176_s8 = sand.u32 (!%p171_p12), 1, %s521_s13  }
  0x15   : > { %174 = sbr.rel (%p171_p12) target bundleno = 169 (0xa9), region = 32  ;;  %s389_s9 = sshll.u32 (!%p171_p12), %s176_s8, 3 }
  0x16   : > { %s177_s10 = scalar_lea.sflag (!%p171_p12), [#allocation3], %s176_s8  ;;  %s180_s11 = scalar_lea.vmem (!%p171_p12), [#allocation2], %s389_s9 }
  0x1a   : > { %512 = dma.done.wait (%p603_p7), %s177_s10, 128  }
  0x1b   : > { %514 = vsyncadd (%p603_p7), %s177_s10, 4294967168  ;;  %v539_v0 = vmov 0   ;;  %v220_v1 = vld [vmem:[%s180_s11] sm:$0xff]  ;;  %v221_v2 = vld [vmem:[%s659_s2] sm:$0x7]  ;;  %vm235_vm0 = vcmask 1043456  }
  0x1c   : > { %456 = vset.pattern.permute.xlu0 %v539_v0  ;;  %228 = vst [vmem:[#allocation1] ss:$2 sm:$0xff] %v220_v1  ;;  %v219_v3 = vld [vmem:[%s658_s1] sm:$0x7]  ;;  %vm231_vm1 = vcmask 31744   ;;  %p210_p13 = scmp.lt.s32.totalorder %s529_s15, 1 }
  0x1d   : > { %224 = vperm.xlu0 %456, %v221_v2  }
  0x1e   : > { %s671_s15 = smov (!%p210_p13, %s529_s15), 1 }
  0x1f   : > { %s399_s22 = sshll.u32 %s671_s15, 3 }
  0x20   : > { %s217_s26 = scalar_lea.vmem %s660_s3, %s399_s22 }
  0x23   : > { %v229_v4 = vld.sshfl [vmem:[#allocation1] sm:$0xff pattern:$0x75316420]  ;;  %v230_v5 = vld.sshfl [vmem:[#allocation1 + $0x8] sm:$0xff pattern:$0x75316420] }
  0x24   : > { %392 = vmatpush.msk.msra.mxu0 %vm235_vm0, %v229_v4  ;;  %394 = vmatpush.msk.msra.mxu1 %vm235_vm0, %v230_v5 }
  0x25   : > { %393 = vmatmul.msk.f32.vlgmr.msra.gmra.mxu0 %vm231_vm1, %v219_v3  ;;  %395 = vmatmul.msk.f32.vlgmr.msra.gmra.mxu1 %vm231_vm1, %v219_v3 }
  0x8f   : > { %v225_v6 = vpop.permute.xlu0 %224 }
  0xa2   : > { %v257_v7 = vpop.f32.mrf.mxu0  ;;  %v277_v8 = vpop.f32.mrf.mxu1 }
  0xa3   : > { %v278_v9 = vadd.f32 %v277_v8, %v225_v6  ;;  %v258_v10 = vadd.f32 %v257_v7, %v225_v6 }
  0xa5   : > { %v282_v11 = vrot.slane %v278_v9, 4 }
  0xa7   : > { %v283_v12 = vsel %vm235_vm0, %v258_v10, %v282_v11 }
  0xa8   : > { %285 = vst [vmem:[%s217_s26] sm:$0x77] %v283_v12 }
  0xa9 PF: > { %s16_s17 = sadd.s32 1, %s537_s17   ;;  %s663_s12 = smov %s521_s13 }
  0xaa   : > { %p13_p0 = scmp.ge.s32.totalorder %s16_s17, 4   ;;  %s664_s13 = smov %s525_s14 }
  0xab   : > { %s665_s14 = smov %s609_s24  ;;  %s666_s15 = smov %s533_s16 }
  0xac   : > { %s667_s16 = smov %s669_s19  ;;  %15 = sbr.rel (!%p13_p0) target bundleno = 4 (0x4), region = 72 }
  0xb1   :  { %316 = vsyncpa [#allocation3], 1 }
  0xb2   :  { %318 = vsyncpa [#allocation3 + $0x1], 1 }

</bundles_post_ra>
